<compile_context>
chip_gen: v6e
topology: v6e:2x2x1
jax: 0.10.0
libtpu: 0.0.40
codegen_flags: <defaults>
</compile_context>

<pallas_src>
import functools

import numpy as np
import jax
import jax.numpy as jnp
from jax import lax
from jax.experimental import pallas as pl
from jax.experimental.pallas import tpu as pltpu

_W = 8          # input spatial width (8x8 board)
_L = _W * _W    # flattened spatial length per channel (64 lanes)


# ------------------------------ fused kernel -------------------------------

def _dqn_fused_kernel(x_ref, f_ref,
                      w1band_ref, b1v_ref, w2band_ref, b2v_ref,
                      w1a_ref, w1b_ref, b1l_ref,
                      w2t_ref, b2l_ref, w3t_ref, b3l_ref,
                      o_ref, *, tb):
    def shift_left(v, s):
        # u[:, p] = v[:, p + s] for p < N - s, zeros elsewhere (static lane shift).
        return jnp.concatenate([v[:, s:], jnp.zeros((tb, s), v.dtype)], axis=1)

    # ---- conv1 (2->4 ch, 3x3 valid) + ReLU as one banded MXU matmul ----
    x = x_ref[...]                                               # (tb, 128)
    c1 = jnp.maximum(
        jnp.dot(x, w1band_ref[...], preferred_element_type=jnp.float32)
        + b1v_ref[...], 0.0)                                     # (tb, 256)

    # ---- conv2 (4->8 ch, 3x3 valid) + ReLU as one banded MXU matmul ----
    c2 = jnp.maximum(
        jnp.dot(c1, w2band_ref[...], preferred_element_type=jnp.float32)
        + b2v_ref[...], 0.0)                                     # (tb, 512)

    # ---- 2x2 max pool: pooled(co,ph,pw) ends up at lane co*64 + 16*ph + 2*pw ----
    a = jnp.maximum(c2, shift_left(c2, 1))                       # pair columns
    pooled = jnp.maximum(a, shift_left(a, _W))                   # pair rows  (tb, 512)

    # ---- MLP head on the MXU (pooled-lane selection is baked into w1a) ----
    h = jnp.dot(pooled, w1a_ref[...], preferred_element_type=jnp.float32)
    h = h + jnp.dot(f_ref[...], w1b_ref[...], preferred_element_type=jnp.float32)
    h = jnp.maximum(h + b1l_ref[...], 0.0)                       # (tb, 128)
    h = jnp.maximum(
        jnp.dot(h, w2t_ref[...], preferred_element_type=jnp.float32) + b2l_ref[...], 0.0)
    o_ref[...] = (jnp.dot(h, w3t_ref[...], preferred_element_type=jnp.float32)
                  + b3l_ref[...]).astype(o_ref.dtype)


# ------------------------------ params -------------------------------------

def init_params(key):
    # PyTorch-like uniform(-1/sqrt(fan_in), 1/sqrt(fan_in)) init, torch layouts.
    def _uniform(k, shape, fan_in):
        bound = 1.0 / float(fan_in) ** 0.5
        return jax.random.uniform(k, shape, jnp.float32, -bound, bound)
    ks = jax.random.split(key, 10)
    return {
        "conv1_w": _uniform(ks[0], (4, 2, 3, 3), 2 * 9),
        "conv1_b": _uniform(ks[1], (4,), 2 * 9),
        "conv2_w": _uniform(ks[2], (8, 4, 3, 3), 4 * 9),
        "conv2_b": _uniform(ks[3], (8,), 4 * 9),
        "l1_w": _uniform(ks[4], (128, 89), 89),
        "l1_b": _uniform(ks[5], (128,), 89),
        "l2_w": _uniform(ks[6], (128, 128), 128),
        "l2_b": _uniform(ks[7], (128,), 128),
        "l3_w": _uniform(ks[8], (5, 128), 128),
        "l3_b": _uniform(ks[9], (5,), 128),
    }


def prepare_params(p):
    """One-time repack of torch-layout params into the kernel layout (host side)."""
    w1 = np.asarray(p["conv1_w"], np.float32)                    # (4,2,3,3)
    b1 = np.asarray(p["conv1_b"], np.float32)
    w2 = np.asarray(p["conv2_w"], np.float32)                    # (8,4,3,3)
    b2 = np.asarray(p["conv2_b"], np.float32)

    # Banded conv1 matrix: row = input lane (ci*64 + y*8 + x), col = output lane
    # (co*64 + h*8 + w); only valid output positions (h,w < 6) are filled.
    w1band = np.zeros((2 * _L, 4 * _L), np.float32)
    for co in range(4):
        for ci in range(2):
            for dy in range(3):
                for dx in range(3):
                    for h in range(6):
                        for w in range(6):
                            w1band[ci * _L + (h + dy) * _W + (w + dx),
                                   co * _L + h * _W + w] = w1[co, ci, dy, dx]
    b1v = np.repeat(b1, _L)[None, :]                             # (1, 256)

    # Banded conv2 matrix: only valid output positions (h,w < 4) are filled; these
    # read only valid conv1 lanes (h,w <= 5).
    w2band = np.zeros((4 * _L, 8 * _L), np.float32)
    for co in range(8):
        for ci in range(4):
            for dy in range(3):
                for dx in range(3):
                    for h in range(4):
                        for w in range(4):
                            w2band[ci * _L + (h + dy) * _W + (w + dx),
                                   co * _L + h * _W + w] = w2[co, ci, dy, dx]
    b2v = np.repeat(b2, _L)[None, :]                             # (1, 512)

    # Scatter the 32 pooled-feature rows of layer1 into a (512, 128) matrix indexed by
    # the lane each pooled value occupies in the kernel's (tb, 512) pooled tensor.
    w1t = np.asarray(p["l1_w"], np.float32).T                    # (89, 128)
    w1a = np.zeros((8 * _L, 128), np.float32)
    k = 0
    for co in range(8):
        for ph in range(2):
            for pw in range(2):
                w1a[co * _L + (2 * ph) * _W + (2 * pw)] = w1t[k]  # torch flatten order
                k += 1

    return {
        "w1band": jnp.asarray(w1band), "b1v": jnp.asarray(b1v),   # (128,256) (1,256)
        "w2band": jnp.asarray(w2band), "b2v": jnp.asarray(b2v),   # (256,512) (1,512)
        "w1a": jnp.asarray(w1a),                                  # (512,128)
        "w1b": jnp.asarray(w1t[32:]),                             # (57,128)
        "b1l": jnp.asarray(p["l1_b"]).reshape(1, 128).astype(jnp.float32),
        "w2t": jnp.asarray(p["l2_w"]).T.astype(jnp.float32),      # (128,128)
        "b2l": jnp.asarray(p["l2_b"]).reshape(1, 128).astype(jnp.float32),
        "w3t": jnp.asarray(p["l3_w"]).T.astype(jnp.float32),      # (128,5)
        "b3l": jnp.asarray(p["l3_b"]).reshape(1, 5).astype(jnp.float32),
    }


# ------------------------------ forward ------------------------------------

def dqn_forward(kp, x, f):
    """x: (B, 2, 8, 8) NCHW, f: (B, 57) -> (B, 5)."""
    B = x.shape[0]
    TB = B if B <= 256 else 256
    nb = (B + TB - 1) // TB
    Bp = nb * TB
    if Bp != B:
        x = jnp.pad(x, ((0, Bp - B), (0, 0), (0, 0), (0, 0)))
        f = jnp.pad(f, ((0, Bp - B), (0, 0)))
    # channel-major flattened-spatial layout: (Bp, 128) = [ch0 64 lanes | ch1 64 lanes]
    x_l = x.reshape(Bp, 2 * _L)

    const = lambda i: (0, 0)
    out = pl.pallas_call(
        functools.partial(_dqn_fused_kernel, tb=TB),
        out_shape=jax.ShapeDtypeStruct((Bp, 5), jnp.float32),
        grid=(nb,),
        in_specs=[
            pl.BlockSpec((TB, 2 * _L), lambda i: (i, 0)),   # x (lane-packed channels)
            pl.BlockSpec((TB, 57), lambda i: (i, 0)),       # f
            pl.BlockSpec((2 * _L, 4 * _L), const),          # conv1 band matrix
            pl.BlockSpec((1, 4 * _L), const),               # conv1 bias (lane-repeated)
            pl.BlockSpec((4 * _L, 8 * _L), const),          # conv2 band matrix
            pl.BlockSpec((1, 8 * _L), const),               # conv2 bias (lane-repeated)
            pl.BlockSpec((8 * _L, 128), const),             # w1a (pooled-lane scattered)
            pl.BlockSpec((57, 128), const),                 # w1b
            pl.BlockSpec((1, 128), const),                  # b1
            pl.BlockSpec((128, 128), const),                # w2
            pl.BlockSpec((1, 128), const),                  # b2
            pl.BlockSpec((128, 5), const),                  # w3
            pl.BlockSpec((1, 5), const),                    # b3
        ],
        out_specs=pl.BlockSpec((TB, 5), lambda i: (i, 0)),
        compiler_params=pltpu.CompilerParams(
            dimension_semantics=("parallel",),
            vmem_limit_bytes=32 * 1024 * 1024),
    )(x_l, f, kp["w1band"], kp["b1v"], kp["w2band"], kp["b2v"],
      kp["w1a"], kp["w1b"], kp["b1l"], kp["w2t"], kp["b2l"], kp["w3t"], kp["b3l"])
    return out[:B]


# --------------------------- pure-JAX reference -----------------------------

def dqn_reference(p, x, f):
    dn = ("NCHW", "OIHW", "NCHW")
    c1 = lax.conv_general_dilated(x, p["conv1_w"], (1, 1), "VALID", dimension_numbers=dn)
    c1 = jax.nn.relu(c1 + p["conv1_b"][None, :, None, None])
    c2 = lax.conv_general_dilated(c1, p["conv2_w"], (1, 1), "VALID", dimension_numbers=dn)
    c2 = jax.nn.relu(c2 + p["conv2_b"][None, :, None, None])
    pooled = lax.reduce_window(c2, -jnp.inf, lax.max, (1, 1, 2, 2), (1, 1, 2, 2), "VALID")
    flat = pooled.reshape(x.shape[0], -1)                     # torch flatten order (c,h,w)
    xc = jnp.concatenate([flat, f], axis=-1)
    h = jax.nn.relu(xc @ p["l1_w"].T + p["l1_b"])
    h = jax.nn.relu(h @ p["l2_w"].T + p["l2_b"])
    return h @ p["l3_w"].T + p["l3_b"]


if __name__ == "__main__":
    key = jax.random.PRNGKey(0)
    kparam, kx, kf = jax.random.split(key, 3)
    params = init_params(kparam)
    kernel_params = prepare_params(params)     # one-time weight repack (outside hot path)

    B = 2
    x = jax.random.normal(kx, (B, 2, 8, 8), jnp.float32)   # NCHW like PyTorch
    f = jax.random.normal(kf, (B, 57), jnp.float32)        # 8*2*2 + 57 = 89 = layer1 in

    fwd = jax.jit(dqn_forward)
    out = jax.block_until_ready(fwd(kernel_params, x, f))
    assert out.shape == (B, 5) and out.dtype == jnp.float32

    ref = dqn_reference(params, x, f)
    assert bool(jnp.allclose(out, ref, atol=2e-3, rtol=2e-3)), "mismatch vs reference"

    print("KERNEL_OK")
</pallas_src>

<mosaic_0001>
module attributes {stable_mosaic.version = 11 : i64} {
  func.func @_dqn_fused_kernel(%arg0: i32, %arg1: memref<2x128xf32, #tpu.memory_space<vmem>>, %arg2: memref<2x57xf32, #tpu.memory_space<vmem>>, %arg3: memref<128x256xf32, #tpu.memory_space<vmem>>, %arg4: memref<1x256xf32, #tpu.memory_space<vmem>>, %arg5: memref<256x512xf32, #tpu.memory_space<vmem>>, %arg6: memref<1x512xf32, #tpu.memory_space<vmem>>, %arg7: memref<512x128xf32, #tpu.memory_space<vmem>>, %arg8: memref<57x128xf32, #tpu.memory_space<vmem>>, %arg9: memref<1x128xf32, #tpu.memory_space<vmem>>, %arg10: memref<128x128xf32, #tpu.memory_space<vmem>>, %arg11: memref<1x128xf32, #tpu.memory_space<vmem>>, %arg12: memref<128x5xf32, #tpu.memory_space<vmem>>, %arg13: memref<1x5xf32, #tpu.memory_space<vmem>>, %arg14: memref<2x5xf32, #tpu.memory_space<vmem>>) attributes {dimension_semantics = [#tpu.dimension_semantics<parallel>], iteration_bounds = array<i64: 1>, scalar_prefetch = 0 : i64, scratch_operands = 0 : i64, tpu.core_type = #tpu.core_type<tc>, window_params = [{transform_indices = @transform_0, window_bounds = array<i64: 2, 128>}, {transform_indices = @transform_1, window_bounds = array<i64: 2, 57>}, {pipeline_mode = #tpu.pipeline_mode<synchronous>, transform_indices = @transform_2, window_bounds = array<i64: 128, 256>}, {pipeline_mode = #tpu.pipeline_mode<synchronous>, transform_indices = @transform_3, window_bounds = array<i64: 1, 256>}, {pipeline_mode = #tpu.pipeline_mode<synchronous>, transform_indices = @transform_4, window_bounds = array<i64: 256, 512>}, {pipeline_mode = #tpu.pipeline_mode<synchronous>, transform_indices = @transform_5, window_bounds = array<i64: 1, 512>}, {pipeline_mode = #tpu.pipeline_mode<synchronous>, transform_indices = @transform_6, window_bounds = array<i64: 512, 128>}, {pipeline_mode = #tpu.pipeline_mode<synchronous>, transform_indices = @transform_7, window_bounds = array<i64: 57, 128>}, {pipeline_mode = #tpu.pipeline_mode<synchronous>, transform_indices = @transform_8, window_bounds = array<i64: 1, 128>}, {pipeline_mode = #tpu.pipeline_mode<synchronous>, transform_indices = @transform_9, window_bounds = array<i64: 128, 128>}, {pipeline_mode = #tpu.pipeline_mode<synchronous>, transform_indices = @transform_10, window_bounds = array<i64: 1, 128>}, {pipeline_mode = #tpu.pipeline_mode<synchronous>, transform_indices = @transform_11, window_bounds = array<i64: 128, 5>}, {pipeline_mode = #tpu.pipeline_mode<synchronous>, transform_indices = @transform_12, window_bounds = array<i64: 1, 5>}, {transform_indices = @transform_13, window_bounds = array<i64: 2, 5>}]} {
    %c0 = arith.constant 0 : index
    %c0_0 = arith.constant 0 : index
    %0 = vector.load %arg1[%c0, %c0_0] : memref<2x128xf32, #tpu.memory_space<vmem>>, vector<2x128xf32>
    %c0_1 = arith.constant 0 : index
    %c0_2 = arith.constant 0 : index
    %1 = vector.load %arg3[%c0_1, %c0_2] : memref<128x256xf32, #tpu.memory_space<vmem>>, vector<128x256xf32>
    %cst = arith.constant dense<0.000000e+00> : vector<2x256xf32>
    %2 = tpu.matmul %0, %1, %cst {dimension_numbers = #tpu.dot_dimension_numbers<[1], [0], [0], [1], [0, 0, 1, 1], [], []>} : vector<2x128xf32>, vector<128x256xf32>, vector<2x256xf32> -> vector<2x256xf32>
    %c0_3 = arith.constant 0 : index
    %c0_4 = arith.constant 0 : index
    %3 = vector.load %arg4[%c0_3, %c0_4] : memref<1x256xf32, #tpu.memory_space<vmem>>, vector<1x256xf32>
    %4 = vector.broadcast %3 : vector<1x256xf32> to vector<2x256xf32>
    %5 = arith.addf %2, %4 : vector<2x256xf32>
    %cst_5 = arith.constant 0.000000e+00 : f32
    %6 = vector.broadcast %cst_5 : f32 to vector<2x256xf32>
    %7 = arith.maximumf %5, %6 : vector<2x256xf32>
    %c0_6 = arith.constant 0 : index
    %c0_7 = arith.constant 0 : index
    %8 = vector.load %arg5[%c0_6, %c0_7] : memref<256x512xf32, #tpu.memory_space<vmem>>, vector<256x512xf32>
    %cst_8 = arith.constant dense<0.000000e+00> : vector<2x512xf32>
    %9 = tpu.matmul %7, %8, %cst_8 {dimension_numbers = #tpu.dot_dimension_numbers<[1], [0], [0], [1], [0, 0, 1, 1], [], []>} : vector<2x256xf32>, vector<256x512xf32>, vector<2x512xf32> -> vector<2x512xf32>
    %c0_9 = arith.constant 0 : index
    %c0_10 = arith.constant 0 : index
    %10 = vector.load %arg6[%c0_9, %c0_10] : memref<1x512xf32, #tpu.memory_space<vmem>>, vector<1x512xf32>
    %11 = vector.broadcast %10 : vector<1x512xf32> to vector<2x512xf32>
    %12 = arith.addf %9, %11 : vector<2x512xf32>
    %cst_11 = arith.constant 0.000000e+00 : f32
    %13 = vector.broadcast %cst_11 : f32 to vector<2x512xf32>
    %14 = arith.maximumf %12, %13 : vector<2x512xf32>
    %15 = vector.extract_strided_slice %14 {offsets = [0, 1], sizes = [2, 511], strides = [1, 1]} : vector<2x512xf32> to vector<2x511xf32>
    %cst_12 = arith.constant 0.000000e+00 : f32
    %16 = vector.broadcast %cst_12 : f32 to vector<2x1xf32>
    %17 = tpu.concatenate %15, %16 in 1 : vector<2x511xf32>, vector<2x1xf32> -> vector<2x512xf32>
    %18 = arith.maximumf %14, %17 : vector<2x512xf32>
    %19 = vector.extract_strided_slice %18 {offsets = [0, 8], sizes = [2, 504], strides = [1, 1]} : vector<2x512xf32> to vector<2x504xf32>
    %cst_13 = arith.constant 0.000000e+00 : f32
    %20 = vector.broadcast %cst_13 : f32 to vector<2x8xf32>
    %21 = tpu.concatenate %19, %20 in 1 : vector<2x504xf32>, vector<2x8xf32> -> vector<2x512xf32>
    %22 = arith.maximumf %18, %21 : vector<2x512xf32>
    %c0_14 = arith.constant 0 : index
    %c0_15 = arith.constant 0 : index
    %23 = vector.load %arg7[%c0_14, %c0_15] : memref<512x128xf32, #tpu.memory_space<vmem>>, vector<512x128xf32>
    %cst_16 = arith.constant dense<0.000000e+00> : vector<2x128xf32>
    %24 = tpu.matmul %22, %23, %cst_16 {dimension_numbers = #tpu.dot_dimension_numbers<[1], [0], [0], [1], [0, 0, 1, 1], [], []>} : vector<2x512xf32>, vector<512x128xf32>, vector<2x128xf32> -> vector<2x128xf32>
    %c0_17 = arith.constant 0 : index
    %c0_18 = arith.constant 0 : index
    %25 = vector.load %arg2[%c0_17, %c0_18] : memref<2x57xf32, #tpu.memory_space<vmem>>, vector<2x57xf32>
    %c0_19 = arith.constant 0 : index
    %c0_20 = arith.constant 0 : index
    %26 = vector.load %arg8[%c0_19, %c0_20] : memref<57x128xf32, #tpu.memory_space<vmem>>, vector<57x128xf32>
    %cst_21 = arith.constant dense<0.000000e+00> : vector<2x128xf32>
    %27 = tpu.matmul %25, %26, %cst_21 {dimension_numbers = #tpu.dot_dimension_numbers<[1], [0], [0], [1], [0, 0, 1, 1], [], []>} : vector<2x57xf32>, vector<57x128xf32>, vector<2x128xf32> -> vector<2x128xf32>
    %28 = arith.addf %24, %27 : vector<2x128xf32>
    %c0_22 = arith.constant 0 : index
    %c0_23 = arith.constant 0 : index
    %29 = vector.load %arg9[%c0_22, %c0_23] : memref<1x128xf32, #tpu.memory_space<vmem>>, vector<1x128xf32>
    %30 = vector.broadcast %29 : vector<1x128xf32> to vector<2x128xf32>
    %31 = arith.addf %28, %30 : vector<2x128xf32>
    %cst_24 = arith.constant 0.000000e+00 : f32
    %32 = vector.broadcast %cst_24 : f32 to vector<2x128xf32>
    %33 = arith.maximumf %31, %32 : vector<2x128xf32>
    %c0_25 = arith.constant 0 : index
    %c0_26 = arith.constant 0 : index
    %34 = vector.load %arg10[%c0_25, %c0_26] : memref<128x128xf32, #tpu.memory_space<vmem>>, vector<128x128xf32>
    %cst_27 = arith.constant dense<0.000000e+00> : vector<2x128xf32>
    %35 = tpu.matmul %33, %34, %cst_27 {dimension_numbers = #tpu.dot_dimension_numbers<[1], [0], [0], [1], [0, 0, 1, 1], [], []>} : vector<2x128xf32>, vector<128x128xf32>, vector<2x128xf32> -> vector<2x128xf32>
    %c0_28 = arith.constant 0 : index
    %c0_29 = arith.constant 0 : index
    %36 = vector.load %arg11[%c0_28, %c0_29] : memref<1x128xf32, #tpu.memory_space<vmem>>, vector<1x128xf32>
    %37 = vector.broadcast %36 : vector<1x128xf32> to vector<2x128xf32>
    %38 = arith.addf %35, %37 : vector<2x128xf32>
    %cst_30 = arith.constant 0.000000e+00 : f32
    %39 = vector.broadcast %cst_30 : f32 to vector<2x128xf32>
    %40 = arith.maximumf %38, %39 : vector<2x128xf32>
    %c0_31 = arith.constant 0 : index
    %c0_32 = arith.constant 0 : index
    %41 = vector.load %arg12[%c0_31, %c0_32] : memref<128x5xf32, #tpu.memory_space<vmem>>, vector<128x5xf32>
    %cst_33 = arith.constant dense<0.000000e+00> : vector<2x5xf32>
    %42 = tpu.matmul %40, %41, %cst_33 {dimension_numbers = #tpu.dot_dimension_numbers<[1], [0], [0], [1], [0, 0, 1, 1], [], []>} : vector<2x128xf32>, vector<128x5xf32>, vector<2x5xf32> -> vector<2x5xf32>
    %c0_34 = arith.constant 0 : index
    %c0_35 = arith.constant 0 : index
    %43 = vector.load %arg13[%c0_34, %c0_35] : memref<1x5xf32, #tpu.memory_space<vmem>>, vector<1x5xf32>
    %44 = vector.broadcast %43 : vector<1x5xf32> to vector<2x5xf32>
    %45 = arith.addf %42, %44 : vector<2x5xf32>
    %c0_36 = arith.constant 0 : index
    %c0_37 = arith.constant 0 : index
    %46 = vector.load %arg14[%c0_36, %c0_37] : memref<2x5xf32, #tpu.memory_space<vmem>>, vector<2x5xf32>
    tpu.vector_store %arg14[%c0_36, %c0_37], %45 {strides = array<i32>} : memref<2x5xf32, #tpu.memory_space<vmem>>, vector<2x5xf32>,
    return
  }
  func.func @transform_0(%arg0: i32) -> (i32, i32) {
    %c0_i32 = arith.constant 0 : i32
    %c0_i32_0 = arith.constant 0 : i32
    return %arg0, %c0_i32 : i32, i32
  }
  func.func @transform_1(%arg0: i32) -> (i32, i32) {
    %c0_i32 = arith.constant 0 : i32
    %c0_i32_0 = arith.constant 0 : i32
    return %arg0, %c0_i32 : i32, i32
  }
  func.func @transform_2(%arg0: i32) -> (i32, i32) {
    %c0_i32 = arith.constant 0 : i32
    %c0_i32_0 = arith.constant 0 : i32
    %c0_i32_1 = arith.constant 0 : i32
    return %c0_i32, %c0_i32_0 : i32, i32
  }
  func.func @transform_3(%arg0: i32) -> (i32, i32) {
    %c0_i32 = arith.constant 0 : i32
    %c0_i32_0 = arith.constant 0 : i32
    %c0_i32_1 = arith.constant 0 : i32
    return %c0_i32, %c0_i32_0 : i32, i32
  }
  func.func @transform_4(%arg0: i32) -> (i32, i32) {
    %c0_i32 = arith.constant 0 : i32
    %c0_i32_0 = arith.constant 0 : i32
    %c0_i32_1 = arith.constant 0 : i32
    return %c0_i32, %c0_i32_0 : i32, i32
  }
  func.func @transform_5(%arg0: i32) -> (i32, i32) {
    %c0_i32 = arith.constant 0 : i32
    %c0_i32_0 = arith.constant 0 : i32
    %c0_i32_1 = arith.constant 0 : i32
    return %c0_i32, %c0_i32_0 : i32, i32
  }
  func.func @transform_6(%arg0: i32) -> (i32, i32) {
    %c0_i32 = arith.constant 0 : i32
    %c0_i32_0 = arith.constant 0 : i32
    %c0_i32_1 = arith.constant 0 : i32
    return %c0_i32, %c0_i32_0 : i32, i32
  }
  func.func @transform_7(%arg0: i32) -> (i32, i32) {
    %c0_i32 = arith.constant 0 : i32
    %c0_i32_0 = arith.constant 0 : i32
    %c0_i32_1 = arith.constant 0 : i32
    return %c0_i32, %c0_i32_0 : i32, i32
  }
  func.func @transform_8(%arg0: i32) -> (i32, i32) {
    %c0_i32 = arith.constant 0 : i32
    %c0_i32_0 = arith.constant 0 : i32
    %c0_i32_1 = arith.constant 0 : i32
    return %c0_i32, %c0_i32_0 : i32, i32
  }
  func.func @transform_9(%arg0: i32) -> (i32, i32) {
    %c0_i32 = arith.constant 0 : i32
    %c0_i32_0 = arith.constant 0 : i32
    %c0_i32_1 = arith.constant 0 : i32
    return %c0_i32, %c0_i32_0 : i32, i32
  }
  func.func @transform_10(%arg0: i32) -> (i32, i32) {
    %c0_i32 = arith.constant 0 : i32
    %c0_i32_0 = arith.constant 0 : i32
    %c0_i32_1 = arith.constant 0 : i32
    return %c0_i32, %c0_i32_0 : i32, i32
  }
  func.func @transform_11(%arg0: i32) -> (i32, i32) {
    %c0_i32 = arith.constant 0 : i32
    %c0_i32_0 = arith.constant 0 : i32
    %c0_i32_1 = arith.constant 0 : i32
    return %c0_i32, %c0_i32_0 : i32, i32
  }
  func.func @transform_12(%arg0: i32) -> (i32, i32) {
    %c0_i32 = arith.constant 0 : i32
    %c0_i32_0 = arith.constant 0 : i32
    %c0_i32_1 = arith.constant 0 : i32
    return %c0_i32, %c0_i32_0 : i32, i32
  }
  func.func @transform_13(%arg0: i32) -> (i32, i32) {
    %c0_i32 = arith.constant 0 : i32
    %c0_i32_0 = arith.constant 0 : i32
    return %arg0, %c0_i32 : i32, i32
  }
}

</mosaic_0001>

<bundles_post_ra>
// kernel: dqn_forward.1
= control target key start
LH: loop header
LB: loop body
LE: loop exit
PB: predicated region body
PF: predicated region fallthrough
CT: control target
= control target key end

     0   :  { %18 = vsyncpa [#allocation3], 0  ;;  %s1719_s0 = inlined_call_operand.vmem [shape: f32[2,128], index: 0, kind: input, shape index: {}]   ;;  %s1720_s1 = inlined_call_operand.vmem [shape: f32[2,57], index: 1, kind: input, shape index: {}]   ;;  %s1721_s2 = inlined_call_operand.hbm [shape: f32[128,256], index: 2, kind: input, shape index: {}]   ;;  %s1722_s3 = inlined_call_operand.vmem [shape: f32[1,256], index: 3, kind: input, shape index: {}]   ;;  %s1723_s4 = inlined_call_operand.hbm [shape: f32[256,512], index: 4, kind: input, shape index: {}]   ;;  %s1724_s5 = inlined_call_operand.vmem [shape: f32[1,512], index: 5, kind: input, shape index: {}]   ;;  %s1725_s6 = inlined_call_operand.hbm [shape: f32[512,128], index: 6, kind: input, shape index: {}]   ;;  %s1726_s7 = inlined_call_operand.hbm [shape: f32[57,128], index: 7, kind: input, shape index: {}]   ;;  %s1727_s8 = inlined_call_operand.vmem [shape: f32[1,128], index: 8, kind: input, shape index: {}]   ;;  %s1728_s9 = inlined_call_operand.vmem [shape: f32[128,128], index: 9, kind: input, shape index: {}]   ;;  %s1729_s10 = inlined_call_operand.vmem [shape: f32[1,128], index: 10, kind: input, shape index: {}]   ;;  %s1730_s11 = inlined_call_operand.vmem [shape: f32[128,5], index: 11, kind: input, shape index: {}]   ;;  %s1731_s12 = inlined_call_operand.vmem [shape: f32[1,5], index: 12, kind: input, shape index: {}]   ;;  %s1732_s13 = inlined_call_operand.hbm [shape: f32[2,5], index: 13, kind: output, shape index: {}]  }
   0x1   :  { %19 = vsyncpa [#allocation6], 0 }
   0x2   :  { %20 = vsyncpa [#allocation9], 0 }
   0x3   :  { %21 = vsyncpa [#allocation4], 0  ;;  %s1420_s25 = smov [#allocation5]  }
   0x4   :  { %s45_s26 = sshll.u32 %s1420_s25, 4  ;;  %s46_s26 = int_to_ptr.vmem [resolvable:$true] %s45_s26 }
   0x5   :  { %s1320_s27 = scalar_lea.vmem %s46_s26, 16384  ;;  %p1325_p1 = scmp.lt.s32.totalorder %s46_s26, %s46_s26 }
   0x6   :  { %p1321_p0 = scmp.ne.s32.totalorder %s46_s26, %s1320_s27  ;;  %p1326_p2 = scmp.lt.s32.totalorder %s1320_s27, %s1320_s27 }
   0x8   :  { %p1327_p3 = por %p1326_p2, %p1325_p1 }
   0xa   :  { %p1328_p4 = pnand %p1327_p3, %p1321_p0 }
   0xc   :  { %1331 = shalt.err (!%p1328_p4)
}
   0xd   :  { %s1421_s28 = smov 512   ;;  %s1422_s29 = smov 32  }
   0xe   :  { %51 = dma.hbm_to_vmem [thread:$0]  %s1723_s4, 16384, %s46_s26, [#allocation6], %s1421_s28, %s1421_s28, %s1422_s29  }
   0xf   :  { %s1423_s15 = smov [#allocation2]  }
  0x10   :  { %s31_s16 = sshll.u32 %s1423_s15, 4  ;;  %s32_s16 = int_to_ptr.vmem [resolvable:$true] %s31_s16 }
  0x11   :  { %s1340_s17 = scalar_lea.vmem %s32_s16, 4096  ;;  %p1345_p6 = scmp.lt.s32.totalorder %s32_s16, %s32_s16 }
  0x12   :  { %p1341_p5 = scmp.ne.s32.totalorder %s32_s16, %s1340_s17  ;;  %p1346_p7 = scmp.lt.s32.totalorder %s1340_s17, %s1340_s17 }
  0x14   :  { %p1347_p8 = por %p1346_p7, %p1345_p6 }
  0x16   :  { %p1348_p9 = pnand %p1347_p8, %p1341_p5 }
  0x18   :  { %1351 = shalt.err (!%p1348_p9)
}
  0x19   :  { %s1424_s18 = smov 256   ;;  %s1425_s19 = smov 16  }
  0x1a   :  { %37 = dma.hbm_to_vmem [thread:$0]  %s1721_s2, 4096, %s32_s16, [#allocation3], %s1424_s18, %s1424_s18, %s1425_s19  }
  0x1b   :  { %s1426_s22 = smov [#allocation7]  }
  0x1c   :  { %s59_s23 = sshll.u32 %s1426_s22, 4  ;;  %s60_s23 = int_to_ptr.vmem [resolvable:$true] %s59_s23 }
  0x1d   :  { %s1360_s4 = scalar_lea.vmem %s60_s23, 8192  ;;  %p1365_p11 = scmp.lt.s32.totalorder %s60_s23, %s60_s23 }
  0x1e   :  { %p1361_p10 = scmp.ne.s32.totalorder %s60_s23, %s1360_s4  ;;  %p1366_p12 = scmp.lt.s32.totalorder %s1360_s4, %s1360_s4 }
  0x20   :  { %p1367_p13 = por %p1366_p12, %p1365_p11 }
  0x22   :  { %p1368_p0 = pnand %p1367_p13, %p1361_p10 }
  0x24   :  { %1371 = shalt.err (!%p1368_p0)
}
  0x25   :  { %s1427_s24 = smov 128   ;;  %s1428_s25 = smov 8  }
  0x26   :  { %65 = dma.hbm_to_vmem [thread:$0]  %s1725_s6, 8192, %s60_s23, [#allocation6], %s1427_s24, %s1427_s24, %s1428_s25  }
  0x27   :  { %s1429_s28 = smov [#allocation8]  }
  0x28   :  { %s71_s29 = sshll.u32 %s1429_s28, 4  ;;  %s72_s29 = int_to_ptr.vmem [resolvable:$true] %s71_s29 }
  0x29   :  { %s1380_s2 = scalar_lea.vmem %s72_s29, 1024  ;;  %p1385_p2 = scmp.lt.s32.totalorder %s72_s29, %s72_s29 }
  0x2a   :  { %p1381_p1 = scmp.ne.s32.totalorder %s72_s29, %s1380_s2  ;;  %p1386_p3 = scmp.lt.s32.totalorder %s1380_s2, %s1380_s2 }
  0x2c   :  { %p1387_p4 = por %p1386_p3, %p1385_p2 }
  0x2e   :  { %p1388_p5 = pnand %p1387_p4, %p1381_p1 }
  0x30   :  { %1391 = shalt.err (!%p1388_p5)
}
  0x31   :  { %77 = dma.hbm_to_vmem [thread:$0]  %s1726_s7, 1024, %s72_s29, [#allocation9], %s1427_s24, %s1427_s24, %s1428_s25  }
  0x32   :  { %1412 = dma.done.wait [#allocation3], 4096  }
  0x33   :  { %1413 = vsyncadd [#allocation3], 4294963200 }
  0x34   :  { %1414 = dma.done.wait [#allocation6], 24576  }
  0x35   :  { %1415 = vsyncadd [#allocation6], 4294942720 }
  0x36   :  { %1416 = dma.done.wait [#allocation9], 1024  }
  0x37   :  { %1417 = vsyncadd [#allocation9], 4294966272  ;;  %v1430_v0 = vmov 0.0   ;;  %v132_v1 = vld [vmem:[#allocation2 + $0xf8] sm:$0xff]  ;;  %v131_v2 = vld [vmem:[#allocation2 + $0xf0] sm:$0xff]  ;;  %vm641_vm0 = vcmask 1040384  }
  0x38   :  { %209 = vmatprep.mubr.f32.mxu0 %v1430_v0  ;;  %v130_v3 = vld [vmem:[#allocation2 + $0xe8] sm:$0xff]  ;;  %145 = vmatprep.subr.mxu0 %v132_v1  ;;  %v129_v4 = vld [vmem:[#allocation2 + $0xe0] sm:$0xff]  ;;  %v128_v5 = vld [vmem:[#allocation2 + $0xd8] sm:$0xff]  ;;  %vm1432_vm1 = vmmov 0   ;;  %vm637_vm2 = vcmask 465920   ;;  %vm526_vm3 = vcmask 1039360  }
  0x39   :  { %146 = vmatpush1.msra.mxu0 %v131_v2  ;;  %v127_v6 = vld [vmem:[#allocation2 + $0xd0] sm:$0xff]  ;;  %v126_v7 = vld [vmem:[#allocation2 + $0xc8] sm:$0xff]  ;;  %v125_v8 = vld [vmem:[#allocation2 + $0xc0] sm:$0xff]  ;;  %vm551_vm4 = vcmask 982016   ;;  %vm1051_vm5 = vcmask 33792  }
  0x3a   :  { %147 = vmatprep.subr.mxu0 %v130_v3  ;;  %v124_v9 = vld [vmem:[#allocation2 + $0xb8] sm:$0xff]  ;;  %v123_v10 = vld [vmem:[#allocation2 + $0xb0] sm:$0xff]  ;;  %v122_v11 = vld [vmem:[#allocation2 + $0xa8] sm:$0xff] }
  0x3b   :  { %148 = vmatpush1.msra.mxu0 %v129_v4  ;;  %v121_v12 = vld [vmem:[#allocation2 + $0xa0] sm:$0xff]  ;;  %v120_v13 = vld [vmem:[#allocation2 + $0x98] sm:$0xff]  ;;  %v119_v14 = vld [vmem:[#allocation2 + $0x90] sm:$0xff] }
  0x3c   :  { %149 = vmatprep.subr.mxu0 %v128_v5  ;;  %v279_v15 = vld [vmem:[#allocation5 + $0x1e8] sm:$0xff]  ;;  %v278_v16 = vld [vmem:[#allocation5 + $0x1e0] sm:$0xff]  ;;  %v116_v22 = vld [vmem:[#allocation2 + $0x78] sm:$0xff] }
  0x3d   :  { %150 = vmatpush1.msra.mxu0 %v127_v6  ;;  %v118_v17 = vld [vmem:[#allocation2 + $0x88] sm:$0xff]  ;;  %368 = vmatprep.subr.mxu1 %v279_v15  ;;  %v117_v19 = vld [vmem:[#allocation2 + $0x80] sm:$0xff]  ;;  %v115_v24 = vld [vmem:[#allocation2 + $0x70] sm:$0xff] }
  0x3e   :  { %151 = vmatprep.subr.mxu0 %v126_v7  ;;  %v275_v18 = vld [vmem:[#allocation5 + $0x1c8] sm:$0xff]  ;;  %369 = vmatpush1.msra.mxu1 %v278_v16  ;;  %v274_v20 = vld [vmem:[#allocation5 + $0x1c0] sm:$0xff]  ;;  %v112_v30 = vld [vmem:[#allocation2 + $0x58] sm:$0xff] }
  0x3f   :  { %152 = vmatpush1.msra.mxu0 %v125_v8  ;;  %v271_v21 = vld [vmem:[#allocation5 + $0x1a8] sm:$0xff]  ;;  %370 = vmatprep.subr.mxu1 %v275_v18  ;;  %v270_v23 = vld [vmem:[#allocation5 + $0x1a0] sm:$0xff]  ;;  %v111_v32 = vld [vmem:[#allocation2 + $0x50] sm:$0xff] }
  0x40   :  { %153 = vmatprep.subr.mxu0 %v124_v9  ;;  %371 = vmatpush1.msra.mxu1 %v274_v20  ;;  %v267_v25 = vld [vmem:[#allocation5 + $0x188] sm:$0xff]  ;;  %v266_v27 = vld [vmem:[#allocation5 + $0x180] sm:$0xff]  ;;  %v108_v38 = vld [vmem:[#allocation2 + $0x38] sm:$0xff] }
  0x41   :  { %154 = vmatpush1.msra.mxu0 %v123_v10  ;;  %v114_v26 = vld [vmem:[#allocation2 + $0x68] sm:$0xff]  ;;  %372 = vmatprep.subr.mxu1 %v271_v21  ;;  %v113_v28 = vld [vmem:[#allocation2 + $0x60] sm:$0xff]  ;;  %v107_v40 = vld [vmem:[#allocation2 + $0x30] sm:$0xff] }
  0x42   :  { %155 = vmatprep.subr.mxu0 %v122_v11  ;;  %373 = vmatpush1.msra.mxu1 %v270_v23  ;;  %v263_v29 = vld [vmem:[#allocation5 + $0x168] sm:$0xff]  ;;  %v262_v31 = vld [vmem:[#allocation5 + $0x160] sm:$0xff]  ;;  %v104_v46 = vld [vmem:[#allocation2 + $0x18] sm:$0xff] }
  0x43   :  { %156 = vmatpush1.msra.mxu0 %v121_v12  ;;  %374 = vmatprep.subr.mxu1 %v267_v25  ;;  %v259_v33 = vld [vmem:[#allocation5 + $0x148] sm:$0xff]  ;;  %v258_v35 = vld [vmem:[#allocation5 + $0x140] sm:$0xff]  ;;  %v103_v48 = vld [vmem:[#allocation2 + $0x10] sm:$0xff] }
  0x44   :  { %157 = vmatprep.subr.mxu0 %v120_v13  ;;  %375 = vmatpush1.msra.mxu1 %v266_v27  ;;  %v110_v34 = vld [vmem:[#allocation2 + $0x48] sm:$0xff]  ;;  %v109_v36 = vld [vmem:[#allocation2 + $0x40] sm:$0xff]  ;;  %v281_v55 = vld [vmem:[#allocation5 + $0x1f8] sm:$0xff] }
  0x45   :  { %158 = vmatpush1.msra.mxu0 %v119_v14  ;;  %376 = vmatprep.subr.mxu1 %v263_v29  ;;  %v255_v37 = vld [vmem:[#allocation5 + $0x128] sm:$0xff]  ;;  %v254_v39 = vld [vmem:[#allocation5 + $0x120] sm:$0xff]  ;;  %v280_v56 = vld [vmem:[#allocation5 + $0x1f0] sm:$0xff] }
  0x46   :  { %159 = vmatprep.subr.mxu0 %v118_v17  ;;  %377 = vmatpush1.msra.mxu1 %v262_v31  ;;  %v251_v41 = vld [vmem:[#allocation5 + $0x108] sm:$0xff]  ;;  %v250_v43 = vld [vmem:[#allocation5 + $0x100] sm:$0xff]  ;;  %v277_v58 = vld [vmem:[#allocation5 + $0x1d8] sm:$0xff] }
  0x47   :  { %160 = vmatpush1.msra.mxu0 %v117_v19  ;;  %378 = vmatprep.subr.mxu1 %v259_v33  ;;  %v106_v42 = vld [vmem:[#allocation2 + $0x28] sm:$0xff]  ;;  %v105_v44 = vld [vmem:[#allocation2 + $0x20] sm:$0xff]  ;;  %v276_v60 = vld [vmem:[#allocation5 + $0x1d0] sm:$0xff] }
  0x48   :  { %161 = vmatprep.subr.mxu0 %v116_v22  ;;  %379 = vmatpush1.msra.mxu1 %v258_v35  ;;  %v247_v45 = vld [vmem:[#allocation5 + $0xe8] sm:$0xff]  ;;  %v246_v47 = vld [vmem:[#allocation5 + $0xe0] sm:$0xff]  ;;  %v273_v62 = vld [vmem:[#allocation5 + $0x1b8] sm:$0xff] }
  0x49   :  { %162 = vmatpush1.msra.mxu0 %v115_v24  ;;  %380 = vmatprep.subr.mxu1 %v255_v37  ;;  %v243_v49 = vld [vmem:[#allocation5 + $0xc8] sm:$0xff]  ;;  %v242_v51 = vld [vmem:[#allocation5 + $0xc0] sm:$0xff]  ;;  %v272_v1 = vld [vmem:[#allocation5 + $0x1b0] sm:$0xff] }
  0x4a   :  { %163 = vmatprep.subr.mxu0 %v114_v26  ;;  %381 = vmatpush1.msra.mxu1 %v254_v39  ;;  %v102_v50 = vld [vmem:[#allocation2 + $0x8] sm:$0xff]  ;;  %v101_v52 = vld [vmem:[#allocation2] sm:$0xff]  ;;  %v269_v3 = vld [vmem:[#allocation5 + $0x198] sm:$0xff] }
  0x4b   :  { %164 = vmatpush1.msra.mxu0 %v113_v28  ;;  %382 = vmatprep.subr.mxu1 %v251_v41  ;;  %v239_v53 = vld [vmem:[#allocation5 + $0xa8] sm:$0xff]  ;;  %v100_v54 = vld [vmem:[%s1719_s0] sm:$0x3]  ;;  %v268_v5 = vld [vmem:[#allocation5 + $0x190] sm:$0xff]  ;;  %s1434_s0 = smov [#allocation10]  }
  0x4c   :  { %165 = vmatprep.subr.mxu0 %v112_v30  ;;  %383 = vmatpush1.msra.mxu1 %v250_v43  ;;  %v238_v57 = vld [vmem:[#allocation5 + $0xa0] sm:$0xff]  ;;  %v235_v59 = vld [vmem:[#allocation5 + $0x88] sm:$0xff]  ;;  %v265_v7 = vld [vmem:[#allocation5 + $0x178] sm:$0xff]  ;;  %s1059_s15 = sshll.u32 %s1434_s0, 4  ;;  %s1060_s15 = int_to_ptr.vmem [resolvable:$true] %s1059_s15 }
  0x4d   :  { %166 = vmatpush1.msra.mxu0 %v111_v32  ;;  %384 = vmatprep.subr.mxu1 %v247_v45  ;;  %v234_v61 = vld [vmem:[#allocation5 + $0x80] sm:$0xff]  ;;  %v231_v63 = vld [vmem:[#allocation5 + $0x68] sm:$0xff]  ;;  %v264_v9 = vld [vmem:[#allocation5 + $0x170] sm:$0xff]  ;;  %p1397_p7 = scmp.lt.s32.totalorder %s1060_s15, %s1060_s15 }
  0x4e   :  { %167 = vmatprep.subr.mxu0 %v110_v34  ;;  %385 = vmatpush1.msra.mxu1 %v246_v47  ;;  %v230_v2 = vld [vmem:[#allocation5 + $0x60] sm:$0xff]  ;;  %v227_v4 = vld [vmem:[#allocation5 + $0x48] sm:$0xff]  ;;  %v261_v11 = vld [vmem:[#allocation5 + $0x158] sm:$0xff] }
  0x4f   :  { %168 = vmatpush1.msra.mxu0 %v109_v36  ;;  %386 = vmatprep.subr.mxu1 %v243_v49  ;;  %v226_v6 = vld [vmem:[#allocation5 + $0x40] sm:$0xff]  ;;  %v223_v8 = vld [vmem:[#allocation5 + $0x28] sm:$0xff]  ;;  %v260_v13 = vld [vmem:[#allocation5 + $0x150] sm:$0xff] }
  0x50   :  { %169 = vmatprep.subr.mxu0 %v108_v38  ;;  %387 = vmatpush1.msra.mxu1 %v242_v51  ;;  %v222_v10 = vld [vmem:[#allocation5 + $0x20] sm:$0xff]  ;;  %v219_v12 = vld [vmem:[#allocation5 + $0x8] sm:$0xff]  ;;  %v257_v15 = vld [vmem:[#allocation5 + $0x138] sm:$0xff] }
  0x51   :  { %170 = vmatpush1.msra.mxu0 %v107_v40  ;;  %388 = vmatprep.subr.mxu1 %v239_v53  ;;  %v218_v14 = vld [vmem:[#allocation5] sm:$0xff]  ;;  %v343_v16 = vld [vmem:[#allocation5 + $0x3e8] sm:$0xff]  ;;  %v256_v17 = vld [vmem:[#allocation5 + $0x130] sm:$0xff] }
  0x52   :  { %171 = vmatprep.subr.mxu0 %v106_v42  ;;  %389 = vmatpush1.msra.mxu1 %v238_v57  ;;  %v342_v18 = vld [vmem:[#allocation5 + $0x3e0] sm:$0xff]  ;;  %v253_v19 = vld [vmem:[#allocation5 + $0x118] sm:$0xff]  ;;  %v339_v20 = vld [vmem:[#allocation5 + $0x3c8] sm:$0xff] }
  0x53   :  { %172 = vmatpush1.msra.mxu0 %v105_v44  ;;  %390 = vmatprep.subr.mxu1 %v235_v59  ;;  %v252_v21 = vld [vmem:[#allocation5 + $0x110] sm:$0xff]  ;;  %v338_v22 = vld [vmem:[#allocation5 + $0x3c0] sm:$0xff]  ;;  %v249_v23 = vld [vmem:[#allocation5 + $0xf8] sm:$0xff] }
  0x54   :  { %173 = vmatprep.subr.mxu0 %v104_v46  ;;  %391 = vmatpush1.msra.mxu1 %v234_v61  ;;  %v335_v24 = vld [vmem:[#allocation5 + $0x3a8] sm:$0xff]  ;;  %v248_v25 = vld [vmem:[#allocation5 + $0xf0] sm:$0xff]  ;;  %v334_v26 = vld [vmem:[#allocation5 + $0x3a0] sm:$0xff] }
  0x55   :  { %174 = vmatpush1.msra.mxu0 %v103_v48  ;;  %392 = vmatprep.subr.mxu1 %v231_v63  ;;  %v245_v27 = vld [vmem:[#allocation5 + $0xd8] sm:$0xff]  ;;  %v331_v28 = vld [vmem:[#allocation5 + $0x388] sm:$0xff]  ;;  %v244_v29 = vld [vmem:[#allocation5 + $0xd0] sm:$0xff] }
  0x56   :  { %175 = vmatprep.subr.mxu0 %v102_v50  ;;  %393 = vmatpush1.msra.mxu1 %v230_v2  ;;  %v330_v30 = vld [vmem:[#allocation5 + $0x380] sm:$0xff]  ;;  %v241_v31 = vld [vmem:[#allocation5 + $0xb8] sm:$0xff]  ;;  %v327_v32 = vld [vmem:[#allocation5 + $0x368] sm:$0xff] }
  0x57   :  { %176 = vmatpush1.msra.mxu0 %v101_v52  ;;  %394 = vmatprep.subr.mxu1 %v227_v4  ;;  %v240_v33 = vld [vmem:[#allocation5 + $0xb0] sm:$0xff]  ;;  %v326_v34 = vld [vmem:[#allocation5 + $0x360] sm:$0xff]  ;;  %v237_v35 = vld [vmem:[#allocation5 + $0x98] sm:$0xff] }
  0x58   :  { %210 = vmatmul.mubr.f32.vlgmr.msra.gmra.mxu0 %v100_v54  ;;  %439 = vmatprep.subr.mxu0 %v281_v55  ;;  %v323_v36 = vld [vmem:[#allocation5 + $0x348] sm:$0xff]  ;;  %v236_v37 = vld [vmem:[#allocation5 + $0x90] sm:$0xff]  ;;  %v322_v38 = vld [vmem:[#allocation5 + $0x340] sm:$0xff] }
  0x59   :  { %440 = vmatpush1.msra.mxu0 %v280_v56  ;;  %395 = vmatpush1.msra.mxu1 %v226_v6  ;;  %v233_v39 = vld [vmem:[#allocation5 + $0x78] sm:$0xff]  ;;  %v319_v40 = vld [vmem:[#allocation5 + $0x328] sm:$0xff]  ;;  %v232_v41 = vld [vmem:[#allocation5 + $0x70] sm:$0xff] }
  0x5a   :  { %441 = vmatprep.subr.mxu0 %v277_v58  ;;  %396 = vmatprep.subr.mxu1 %v223_v8  ;;  %v318_v42 = vld [vmem:[#allocation5 + $0x320] sm:$0xff]  ;;  %v229_v43 = vld [vmem:[#allocation5 + $0x58] sm:$0xff]  ;;  %v315_v44 = vld [vmem:[#allocation5 + $0x308] sm:$0xff] }
  0x5b   :  { %442 = vmatpush1.msra.mxu0 %v276_v60  ;;  %397 = vmatpush1.msra.mxu1 %v222_v10  ;;  %v228_v45 = vld [vmem:[#allocation5 + $0x50] sm:$0xff]  ;;  %v314_v46 = vld [vmem:[#allocation5 + $0x300] sm:$0xff]  ;;  %v225_v47 = vld [vmem:[#allocation5 + $0x38] sm:$0xff] }
  0x5c   :  { %443 = vmatprep.subr.mxu0 %v273_v62  ;;  %398 = vmatprep.subr.mxu1 %v219_v12  ;;  %v311_v48 = vld [vmem:[#allocation5 + $0x2e8] sm:$0xff]  ;;  %v224_v49 = vld [vmem:[#allocation5 + $0x30] sm:$0xff]  ;;  %v310_v50 = vld [vmem:[#allocation5 + $0x2e0] sm:$0xff] }
  0x5d   :  { %444 = vmatpush1.msra.mxu0 %v272_v1  ;;  %399 = vmatpush1.msra.mxu1 %v218_v14  ;;  %v221_v51 = vld [vmem:[#allocation5 + $0x18] sm:$0xff]  ;;  %v307_v52 = vld [vmem:[#allocation5 + $0x2c8] sm:$0xff]  ;;  %v220_v53 = vld [vmem:[#allocation5 + $0x10] sm:$0xff] }
  0x5e   :  { %445 = vmatprep.subr.mxu0 %v269_v3  ;;  %400 = vmatprep.subr.mxu1 %v343_v16  ;;  %v306_v54 = vld [vmem:[#allocation5 + $0x2c0] sm:$0xff]  ;;  %v345_v55 = vld [vmem:[#allocation5 + $0x3f8] sm:$0xff]  ;;  %v303_v56 = vld [vmem:[#allocation5 + $0x2a8] sm:$0xff] }
  0x5f   :  { %446 = vmatpush1.msra.mxu0 %v268_v5  ;;  %401 = vmatpush2.msra.mxu1 %v342_v18  ;;  %v344_v57 = vld [vmem:[#allocation5 + $0x3f0] sm:$0xff]  ;;  %v302_v58 = vld [vmem:[#allocation5 + $0x2a0] sm:$0xff]  ;;  %v341_v59 = vld [vmem:[#allocation5 + $0x3d8] sm:$0xff] }
  0x60   :  { %447 = vmatprep.subr.mxu0 %v265_v7  ;;  %402 = vmatprep.subr.mxu1 %v339_v20  ;;  %v299_v60 = vld [vmem:[#allocation5 + $0x288] sm:$0xff]  ;;  %v340_v61 = vld [vmem:[#allocation5 + $0x3d0] sm:$0xff]  ;;  %v298_v62 = vld [vmem:[#allocation5 + $0x280] sm:$0xff] }
  0x61   :  { %448 = vmatpush1.msra.mxu0 %v264_v9  ;;  %403 = vmatpush2.msra.mxu1 %v338_v22  ;;  %v337_v63 = vld [vmem:[#allocation5 + $0x3b8] sm:$0xff]  ;;  %v336_v1 = vld [vmem:[#allocation5 + $0x3b0] sm:$0xff]  ;;  %v295_v20 = vld [vmem:[#allocation5 + $0x268] sm:$0xff] }
  0x62   :  { %449 = vmatprep.subr.mxu0 %v261_v11  ;;  %404 = vmatprep.subr.mxu1 %v335_v24  ;;  %v333_v2 = vld [vmem:[#allocation5 + $0x398] sm:$0xff]  ;;  %v332_v3 = vld [vmem:[#allocation5 + $0x390] sm:$0xff]  ;;  %v294_v22 = vld [vmem:[#allocation5 + $0x260] sm:$0xff] }
  0x63   :  { %450 = vmatpush1.msra.mxu0 %v260_v13  ;;  %405 = vmatpush2.msra.mxu1 %v334_v26  ;;  %v329_v4 = vld [vmem:[#allocation5 + $0x378] sm:$0xff]  ;;  %v328_v5 = vld [vmem:[#allocation5 + $0x370] sm:$0xff]  ;;  %v291_v24 = vld [vmem:[#allocation5 + $0x248] sm:$0xff] }
  0x64   :  { %451 = vmatprep.subr.mxu0 %v257_v15  ;;  %406 = vmatprep.subr.mxu1 %v331_v28  ;;  %v325_v6 = vld [vmem:[#allocation5 + $0x358] sm:$0xff]  ;;  %v324_v7 = vld [vmem:[#allocation5 + $0x350] sm:$0xff]  ;;  %v290_v26 = vld [vmem:[#allocation5 + $0x240] sm:$0xff] }
  0x65   :  { %452 = vmatpush1.msra.mxu0 %v256_v17  ;;  %407 = vmatpush2.msra.mxu1 %v330_v30  ;;  %v321_v8 = vld [vmem:[#allocation5 + $0x338] sm:$0xff]  ;;  %v320_v9 = vld [vmem:[#allocation5 + $0x330] sm:$0xff]  ;;  %v287_v28 = vld [vmem:[#allocation5 + $0x228] sm:$0xff] }
  0x66   :  { %453 = vmatprep.subr.mxu0 %v253_v19  ;;  %408 = vmatprep.subr.mxu1 %v327_v32  ;;  %v317_v10 = vld [vmem:[#allocation5 + $0x318] sm:$0xff]  ;;  %v316_v11 = vld [vmem:[#allocation5 + $0x310] sm:$0xff]  ;;  %v286_v30 = vld [vmem:[#allocation5 + $0x220] sm:$0xff] }
  0x67   :  { %454 = vmatpush1.msra.mxu0 %v252_v21  ;;  %409 = vmatpush2.msra.mxu1 %v326_v34  ;;  %v313_v12 = vld [vmem:[#allocation5 + $0x2f8] sm:$0xff]  ;;  %v312_v13 = vld [vmem:[#allocation5 + $0x2f0] sm:$0xff]  ;;  %v283_v32 = vld [vmem:[#allocation5 + $0x208] sm:$0xff] }
  0x68   :  { %455 = vmatprep.subr.mxu0 %v249_v23  ;;  %410 = vmatprep.subr.mxu1 %v323_v36  ;;  %v309_v14 = vld [vmem:[#allocation5 + $0x2d8] sm:$0xff]  ;;  %v308_v15 = vld [vmem:[#allocation5 + $0x2d0] sm:$0xff]  ;;  %v282_v34 = vld [vmem:[#allocation5 + $0x200] sm:$0xff]  ;;  %v135_v36 = vlaneseq }
  0x69   :  { %456 = vmatpush1.msra.mxu0 %v248_v25  ;;  %411 = vmatpush2.msra.mxu1 %v322_v38  ;;  %v305_v16 = vld [vmem:[#allocation5 + $0x2b8] sm:$0xff]  ;;  %v304_v17 = vld [vmem:[#allocation5 + $0x2b0] sm:$0xff] }
  0x6a   :  { %457 = vmatprep.subr.mxu0 %v245_v27  ;;  %412 = vmatprep.subr.mxu1 %v319_v40  ;;  %v301_v18 = vld [vmem:[#allocation5 + $0x298] sm:$0xff]  ;;  %v300_v19 = vld [vmem:[#allocation5 + $0x290] sm:$0xff] }
  0x6b   :  { %458 = vmatpush1.msra.mxu0 %v244_v29  ;;  %413 = vmatpush2.msra.mxu1 %v318_v42  ;;  %v297_v21 = vld [vmem:[#allocation5 + $0x278] sm:$0xff]  ;;  %v296_v23 = vld [vmem:[#allocation5 + $0x270] sm:$0xff] }
  0x6c   :  { %459 = vmatprep.subr.mxu0 %v241_v31  ;;  %414 = vmatprep.subr.mxu1 %v315_v44  ;;  %v293_v25 = vld [vmem:[#allocation5 + $0x258] sm:$0xff]  ;;  %v292_v27 = vld [vmem:[#allocation5 + $0x250] sm:$0xff] }
  0x6d   :  { %460 = vmatpush1.msra.mxu0 %v240_v33  ;;  %415 = vmatpush2.msra.mxu1 %v314_v46  ;;  %v289_v29 = vld [vmem:[#allocation5 + $0x238] sm:$0xff]  ;;  %v288_v31 = vld [vmem:[#allocation5 + $0x230] sm:$0xff] }
  0x6e   :  { %461 = vmatprep.subr.mxu0 %v237_v35  ;;  %416 = vmatprep.subr.mxu1 %v311_v48  ;;  %v285_v33 = vld [vmem:[#allocation5 + $0x218] sm:$0xff]  ;;  %v284_v35 = vld [vmem:[#allocation5 + $0x210] sm:$0xff] }
  0x6f   :  { %462 = vmatpush1.msra.mxu0 %v236_v37  ;;  %417 = vmatpush2.msra.mxu1 %v310_v50  ;;  %v136_v37 = vshrl.u32 %v135_v36, 7  ;;  %v346_v50 = vld [vmem:[%s1724_s5] sm:$0xf] }
  0x70   :  { %463 = vmatprep.subr.mxu0 %v233_v39  ;;  %418 = vmatprep.subr.mxu1 %v307_v52  ;;  %v133_v39 = vld [vmem:[%s1722_s3] sm:$0x3]  ;;  %s1431_s3 = smov 127  }
  0x71   :  { %464 = vmatpush1.msra.mxu0 %v232_v41  ;;  %419 = vmatpush2.msra.mxu1 %v306_v54  ;;  %v137_v38 = vsub.s32 0, %v136_v37  ;;  %v141_v40 = vsub.s32 1, %v136_v37  ;;  %v604_v36 = vld [vmem:[#allocation7 + $0x140] sm:$0xff] }
  0x72   :  { %465 = vmatprep.subr.mxu0 %v229_v43  ;;  %420 = vmatprep.subr.mxu1 %v303_v56 }
  0x73   :  { %466 = vmatpush1.msra.mxu0 %v228_v45  ;;  %421 = vmatpush2.msra.mxu1 %v302_v58  ;;  %v138_v41 = vrot.slane %v133_v39, %v137_v38  ;;  %v142_v42 = vrot.slane %v133_v39, %v141_v40  ;;  %v592_v39 = vld [vmem:[#allocation7 + $0xe0] sm:$0xff] }
  0x74   :  { %467 = vmatprep.subr.mxu0 %v225_v47  ;;  %422 = vmatprep.subr.mxu1 %v299_v60 }
  0x75   :  { %468 = vmatpush1.msra.mxu0 %v224_v49  ;;  %423 = vmatpush2.msra.mxu1 %v298_v62  ;;  %v358_v49 = vsub.s32 2, %v136_v37 }
  0x76   :  { %469 = vmatprep.subr.mxu0 %v221_v51  ;;  %424 = vmatprep.subr.mxu1 %v295_v20  ;;  %v362_v51 = vsub.s32 3, %v136_v37  ;;  %v608_v20 = vld [vmem:[#allocation7 + $0x160] sm:$0xff]  ;;  %v577_v37 = vld [vmem:[#allocation7 + $0x68] sm:$0xff] }
  0x77   :  { %470 = vmatpush1.msra.mxu0 %v220_v53  ;;  %425 = vmatpush2.msra.mxu1 %v294_v22  ;;  %v359_v52 = vrot.slane %v346_v50, %v358_v49  ;;  %v355_v53 = vrot.slane %v346_v50, %v141_v40  ;;  %v630_v22 = vld [vmem:[#allocation8 + $0x8] sm:$0xff]  ;;  %v603_v40 = vld [vmem:[#allocation7 + $0x138] sm:$0xff]  ;;  %v574_v49 = vld [vmem:[#allocation7 + $0x50] sm:$0xff] }
  0x78   :  { %471 = vmatprep.subr.mxu0 %v345_v55  ;;  %426 = vmatprep.subr.mxu1 %v291_v24  ;;  %v363_v54 = vrot.slane %v346_v50, %v362_v51  ;;  %v622_v24 = vld [vmem:[#allocation7 + $0x1d0] sm:$0xff]  ;;  %v573_v51 = vld [vmem:[#allocation7 + $0x48] sm:$0xff] }
  0x79   :  { %472 = vmatpush2.msra.mxu0 %v344_v57  ;;  %427 = vmatpush2.msra.mxu1 %v290_v26  ;;  %v351_v57 = vrot.slane %v346_v50, %v137_v38  ;;  %v606_v26 = vld [vmem:[#allocation7 + $0x150] sm:$0xff]  ;;  %v619_v38 = vld [vmem:[#allocation7 + $0x1b8] sm:$0xff]  ;;  %v589_v50 = vld [vmem:[#allocation7 + $0xc8] sm:$0xff] }
  0x7a   :  { %473 = vmatprep.subr.mxu0 %v341_v59  ;;  %428 = vmatprep.subr.mxu1 %v287_v28  ;;  %v595_v28 = vld [vmem:[#allocation7 + $0xf8] sm:$0xff] }
  0x7b   :  { %474 = vmatpush2.msra.mxu0 %v340_v61  ;;  %429 = vmatpush2.msra.mxu1 %v286_v30  ;;  %v621_v30 = vld [vmem:[#allocation7 + $0x1c8] sm:$0xff] }
  0x7c   :  { %475 = vmatprep.subr.mxu0 %v337_v63  ;;  %430 = vmatprep.subr.mxu1 %v283_v32  ;;  %v605_v32 = vld [vmem:[#allocation7 + $0x148] sm:$0xff] }
  0x7d   :  { %476 = vmatpush2.msra.mxu0 %v336_v1  ;;  %431 = vmatpush2.msra.mxu1 %v282_v34  ;;  %v620_v34 = vld [vmem:[#allocation7 + $0x1c0] sm:$0xff] }
  0x7e   :  { %477 = vmatprep.subr.mxu0 %v333_v2  ;;  %1188 = vmatprep.subr.mxu1 %v1430_v0 }
  0x7f   :  { %478 = vmatpush2.msra.mxu0 %v332_v3 }
  0x80   :  { %479 = vmatprep.subr.mxu0 %v329_v4 }
  0x81   :  { %480 = vmatpush2.msra.mxu0 %v328_v5 }
  0x82   :  { %481 = vmatprep.subr.mxu0 %v325_v6 }
  0x83   :  { %482 = vmatpush2.msra.mxu0 %v324_v7  ;;  %v636_v7 = vld [vmem:[#allocation8 + $0x38] sm:$0x1] }
  0x84   :  { %483 = vmatprep.subr.mxu0 %v321_v8  ;;  %v635_v8 = vld [vmem:[#allocation8 + $0x30] sm:$0xff] }
  0x85   :  { %484 = vmatpush2.msra.mxu0 %v320_v9  ;;  %v634_v9 = vld [vmem:[#allocation8 + $0x28] sm:$0xff] }
  0x86   :  { %485 = vmatprep.subr.mxu0 %v317_v10  ;;  %v627_v10 = vld [vmem:[#allocation7 + $0x1f8] sm:$0xff] }
  0x87   :  { %486 = vmatpush2.msra.mxu0 %v316_v11  ;;  %v633_v11 = vld [vmem:[#allocation8 + $0x20] sm:$0xff] }
  0x88   :  { %487 = vmatprep.subr.mxu0 %v313_v12  ;;  %v611_v12 = vld [vmem:[#allocation7 + $0x178] sm:$0xff] }
  0x89   :  { %488 = vmatpush2.msra.mxu0 %v312_v13  ;;  %v626_v13 = vld [vmem:[#allocation7 + $0x1f0] sm:$0xff] }
  0x8a   :  { %489 = vmatprep.subr.mxu0 %v309_v14  ;;  %v610_v14 = vld [vmem:[#allocation7 + $0x170] sm:$0xff] }
  0x8b   :  { %490 = vmatpush2.msra.mxu0 %v308_v15  ;;  %v632_v15 = vld [vmem:[#allocation8 + $0x18] sm:$0xff] }
  0x8c   :  { %491 = vmatprep.subr.mxu0 %v305_v16  ;;  %v625_v16 = vld [vmem:[#allocation7 + $0x1e8] sm:$0xff] }
  0x8d   :  { %492 = vmatpush2.msra.mxu0 %v304_v17  ;;  %v609_v17 = vld [vmem:[#allocation7 + $0x168] sm:$0xff] }
  0x8e   :  { %493 = vmatprep.subr.mxu0 %v301_v18  ;;  %v624_v18 = vld [vmem:[#allocation7 + $0x1e0] sm:$0xff] }
  0x8f   :  { %494 = vmatpush2.msra.mxu0 %v300_v19  ;;  %v631_v19 = vld [vmem:[#allocation8 + $0x10] sm:$0xff] }
  0x90   :  { %495 = vmatprep.subr.mxu0 %v297_v21  ;;  %v623_v21 = vld [vmem:[#allocation7 + $0x1d8] sm:$0xff] }
  0x91   :  { %496 = vmatpush2.msra.mxu0 %v296_v23  ;;  %v607_v23 = vld [vmem:[#allocation7 + $0x158] sm:$0xff] }
  0x92   :  { %497 = vmatprep.subr.mxu0 %v293_v25  ;;  %v629_v25 = vld [vmem:[#allocation8] sm:$0xff] }
  0x93   :  { %498 = vmatpush2.msra.mxu0 %v292_v27  ;;  %v628_v27 = vld [vmem:[%s1720_s1] sm:$0x3]  ;;  %s1433_s1 = smov 120  }
  0x94   :  { %499 = vmatprep.subr.mxu0 %v289_v29  ;;  %v579_v29 = vld [vmem:[#allocation7 + $0x78] sm:$0xff] }
  0x95   :  { %500 = vmatpush2.msra.mxu0 %v288_v31  ;;  %v594_v31 = vld [vmem:[#allocation7 + $0xf0] sm:$0xff] }
  0x96   :  { %501 = vmatprep.subr.mxu0 %v285_v33  ;;  %v578_v33 = vld [vmem:[#allocation7 + $0x70] sm:$0xff] }
  0x97   :  { %502 = vmatpush2.msra.mxu0 %v284_v35  ;;  %v593_v35 = vld [vmem:[#allocation7 + $0xe8] sm:$0xff] }
  0x98   :  { %1119 = vmatprep.subr.mxu0 %v627_v10  ;;  %v567_v10 = vld [vmem:[#allocation7 + $0x18] sm:$0xff] }
 0x118   :  { %v211_v43 = vpop.f32.mrf.mxu0 }
 0x119   :  { %v212_v44 = vadd.f32 %v211_v43, %v138_v41  ;;  %v576_v41 = vld [vmem:[#allocation7 + $0x60] sm:$0xff]  ;;  %v591_v43 = vld [vmem:[#allocation7 + $0xd8] sm:$0xff] }
 0x11a   :  { %v213_v45 = vpop.f32.mrf.mxu0 }
 0x11b   :  { %v214_v46 = vadd.f32 %v213_v45, %v142_v42  ;;  %v216_v48 = vmax.f32 %v212_v44, 0.0  ;;  %v618_v42 = vld [vmem:[#allocation7 + $0x1b0] sm:$0xff]  ;;  %v575_v45 = vld [vmem:[#allocation7 + $0x58] sm:$0xff] }
 0x11c   :  { %v602_v44 = vld [vmem:[#allocation7 + $0x130] sm:$0xff] }
 0x11d   :  { %v217_v47 = vmax.f32 %v214_v46, 0.0  ;;  %v617_v46 = vld [vmem:[#allocation7 + $0x1a8] sm:$0xff] }
 0x11f   :  { %432 = vmatprep.mubr.f32.mxu1 %v217_v47  ;;  %503 = vmatprep.mubr.f32.mxu0 %v217_v47  ;;  %v590_v47 = vld [vmem:[#allocation7 + $0xd0] sm:$0xff] }
 0x120   :  { %433 = vmatmul.mubr.f32.vlgmr.msra.gmra.mxu1 %v216_v48  ;;  %504 = vmatmul.mubr.f32.vlgmr.msra.gmra.mxu0 %v216_v48  ;;  %v601_v48 = vld [vmem:[#allocation7 + $0x128] sm:$0xff] }
 0x121   :  { %1189 = vmatpush3.msk.msra.mxu1 %vm641_vm0, %v636_v7  ;;  %1204 = vmatprep.mubr.msk.f32.mxu1 %vm1432_vm1, %v1430_v0  ;;  %v616_v7 = vld [vmem:[#allocation7 + $0x1a0] sm:$0xff] }
 0x122   :  { %1190 = vmatprep.subr.mxu1 %v1430_v0  ;;  %1120 = vmatpush3.msra.mxu0 %v611_v12  ;;  %v615_v12 = vld [vmem:[#allocation7 + $0x198] sm:$0xff] }
 0x123   :  { %1191 = vmatpush3.msra.mxu1 %v635_v8  ;;  %1121 = vmatprep.subr.mxu0 %v626_v13  ;;  %v583_v8 = vld [vmem:[#allocation7 + $0x98] sm:$0xff]  ;;  %v582_v13 = vld [vmem:[#allocation7 + $0x90] sm:$0xff] }
 0x124   :  { %1192 = vmatprep.subr.mxu1 %v1430_v0  ;;  %1122 = vmatpush3.msra.mxu0 %v610_v14  ;;  %v599_v14 = vld [vmem:[#allocation7 + $0x118] sm:$0xff] }
 0x125   :  { %1193 = vmatpush3.msra.mxu1 %v634_v9  ;;  %1123 = vmatprep.subr.mxu0 %v625_v16  ;;  %v600_v9 = vld [vmem:[#allocation7 + $0x120] sm:$0xff] }
 0x126   :  { %1194 = vmatprep.subr.mxu1 %v1430_v0  ;;  %1124 = vmatpush3.msra.mxu0 %v609_v17  ;;  %v566_v17 = vld [vmem:[#allocation7 + $0x10] sm:$0xff] }
 0x127   :  { %1195 = vmatpush3.msra.mxu1 %v633_v11  ;;  %1125 = vmatprep.subr.mxu0 %v624_v18  ;;  %v614_v18 = vld [vmem:[#allocation7 + $0x190] sm:$0xff] }
 0x128   :  { %1196 = vmatprep.subr.mxu1 %v1430_v0  ;;  %1126 = vmatpush3.msra.mxu0 %v608_v20  ;;  %v598_v20 = vld [vmem:[#allocation7 + $0x110] sm:$0xff] }
 0x129   :  { %1197 = vmatpush3.msra.mxu1 %v632_v15  ;;  %1127 = vmatprep.subr.mxu0 %v623_v21 }
 0x12a   :  { %1198 = vmatprep.subr.mxu1 %v1430_v0  ;;  %1128 = vmatpush3.msra.mxu0 %v607_v23  ;;  %v613_v23 = vld [vmem:[#allocation7 + $0x188] sm:$0xff] }
 0x12b   :  { %1199 = vmatpush3.msra.mxu1 %v631_v19  ;;  %1129 = vmatprep.subr.mxu0 %v622_v24  ;;  %v581_v19 = vld [vmem:[#allocation7 + $0x88] sm:$0xff] }
 0x12c   :  { %1200 = vmatprep.subr.mxu1 %v1430_v0  ;;  %1130 = vmatpush3.msra.mxu0 %v606_v26 }
 0x12d   :  { %1201 = vmatpush3.msra.mxu1 %v630_v22  ;;  %1131 = vmatprep.subr.mxu0 %v621_v30  ;;  %v565_v22 = vld [vmem:[#allocation7 + $0x8] sm:$0xff]  ;;  %v612_v30 = vld [vmem:[#allocation7 + $0x180] sm:$0xff] }
 0x12e   :  { %1202 = vmatprep.subr.mxu1 %v1430_v0  ;;  %1132 = vmatpush3.msra.mxu0 %v605_v32 }
 0x12f   :  { %1203 = vmatpush3.msra.mxu1 %v629_v25  ;;  %1133 = vmatprep.subr.mxu0 %v620_v34  ;;  %v596_v34 = vld [vmem:[#allocation7 + $0x100] sm:$0xff] }
 0x130   :  { %1205 = vmatmul.mubr.msk.f32.vlgmr.msra.gmra.mxu1 %vm637_vm2, %v628_v27  ;;  %1084 = vmatprep.subr.mxu1 %v595_v28  ;;  %v580_v27 = vld [vmem:[#allocation7 + $0x80] sm:$0xff]  ;;  %v597_v28 = vld [vmem:[#allocation7 + $0x108] sm:$0xff] }
 0x131   :  { %1085 = vmatpush3.msra.mxu1 %v579_v29  ;;  %1134 = vmatpush3.msra.mxu0 %v604_v36  ;;  %v564_v29 = vld [vmem:[#allocation7] sm:$0xff] }
 0x132   :  { %1086 = vmatprep.subr.mxu1 %v594_v31  ;;  %1135 = vmatprep.subr.mxu0 %v619_v38 }
 0x133   :  { %1087 = vmatpush3.msra.mxu1 %v578_v33  ;;  %1136 = vmatpush3.msra.mxu0 %v603_v40 }
 0x134   :  { %1088 = vmatprep.subr.mxu1 %v593_v35  ;;  %1137 = vmatprep.subr.mxu0 %v618_v42 }
 0x135   :  { %1089 = vmatpush3.msra.mxu1 %v577_v37  ;;  %1138 = vmatpush3.msra.mxu0 %v602_v44 }
 0x136   :  { %1090 = vmatprep.subr.mxu1 %v592_v39  ;;  %1139 = vmatprep.subr.mxu0 %v617_v46 }
 0x137   :  { %1091 = vmatpush3.msra.mxu1 %v576_v41  ;;  %1140 = vmatpush3.msra.mxu0 %v601_v48 }
 0x138   :  { %1092 = vmatprep.subr.mxu1 %v591_v43  ;;  %1141 = vmatprep.subr.mxu0 %v616_v7  ;;  %v866_v7 = vld [vmem:[%s1728_s9 + $0x10] sm:$0xff] }
 0x139   :  { %1093 = vmatpush3.msra.mxu1 %v575_v45  ;;  %1142 = vmatpush3.msra.mxu0 %v600_v9  ;;  %v864_v9 = vld [vmem:[%s1728_s9] sm:$0xff] }
 0x13a   :  { %1094 = vmatprep.subr.mxu1 %v590_v47  ;;  %1143 = vmatprep.subr.mxu0 %v615_v12  ;;  %v971_v12 = vld [vmem:[%s1730_s11 + $0x68] sm:$0xff] }
 0x13b   :  { %1095 = vmatpush3.msra.mxu1 %v574_v49  ;;  %1144 = vmatpush3.msra.mxu0 %v599_v14  ;;  %v879_v49 = vld [vmem:[%s1728_s9 + $0x78] sm:$0xff] }
 0x13c   :  { %1096 = vmatprep.subr.mxu1 %v589_v50  ;;  %1145 = vmatprep.subr.mxu0 %v614_v18  ;;  %v878_v50 = vld [vmem:[%s1728_s9 + $0x70] sm:$0xff]  ;;  %v969_v14 = vld [vmem:[%s1730_s11 + $0x58] sm:$0xff] }
 0x13d   :  { %1097 = vmatpush3.msra.mxu1 %v573_v51  ;;  %1146 = vmatpush3.msra.mxu0 %v598_v20  ;;  %v877_v51 = vld [vmem:[%s1728_s9 + $0x68] sm:$0xff]  ;;  %v965_v18 = vld [vmem:[%s1730_s11 + $0x38] sm:$0xff] }
 0x13e   :  { %1147 = vmatprep.subr.mxu0 %v613_v23  ;;  %v963_v20 = vld [vmem:[%s1730_s11 + $0x28] sm:$0xff] }
 0x13f   :  { %1148 = vmatpush3.msra.mxu0 %v597_v28 }
 0x140   :  { %1149 = vmatprep.subr.mxu0 %v612_v30  ;;  %v1072_v30 = vld [vmem:[%s1727_s8] ss:$0 sm:$0xff] }
 0x141   :  { %1150 = vmatpush3.msra.mxu0 %v596_v34  ;;  %v960_v34 = vld [vmem:[%s1730_s11 + $0x10] sm:$0xff] }
 0x142   :  { %1242 = vmatprep.subr.mxu0 %v1430_v0 }
 0x1e0   :  { %v434_v55 = vpop.f32.mrf.mxu1  ;;  %v505_v56 = vpop.f32.mrf.mxu0 }
 0x1e1   :  { %v1528_v58 = vadd.f32 %v505_v56, %v359_v52  ;;  %v1534_v63 = vadd.f32 %v434_v55, %v351_v57  ;;  %v588_v52 = vld [vmem:[#allocation7 + $0xc0] sm:$0xff]  ;;  %v571_v55 = vld [vmem:[#allocation7 + $0x38] sm:$0xff]  ;;  %v586_v56 = vld [vmem:[#allocation7 + $0xb0] sm:$0xff] }
 0x1e2   :  { %v436_v59 = vpop.f32.mrf.mxu1  ;;  %v507_v60 = vpop.f32.mrf.mxu0  ;;  %1098 = vmatprep.subr.mxu1 %v588_v52  ;;  %v570_v57 = vld [vmem:[#allocation7 + $0x30] sm:$0xff]  ;;  %v876_v52 = vld [vmem:[%s1728_s9 + $0x60] sm:$0xff] }
 0x1e3   :  { %v1530_v61 = vadd.f32 %v436_v59, %v355_v53  ;;  %v1532_v62 = vadd.f32 %v507_v60, %v363_v54  ;;  %v512_v1 = vmax.f32 %v1528_v58, 0.0  ;;  %v510_v5 = vmax.f32 %v1534_v63, 0.0  ;;  %v572_v53 = vld [vmem:[#allocation7 + $0x40] sm:$0xff]  ;;  %v587_v54 = vld [vmem:[#allocation7 + $0xb8] sm:$0xff]  ;;  %v585_v59 = vld [vmem:[#allocation7 + $0xa8] sm:$0xff] }
 0x1e4   :  { %1099 = vmatpush3.msra.mxu1 %v572_v53  ;;  %v569_v60 = vld [vmem:[#allocation7 + $0x28] sm:$0xff]  ;;  %v875_v53 = vld [vmem:[%s1728_s9 + $0x58] sm:$0xff] }
 0x1e5   :  { %v511_v2 = vmax.f32 %v1530_v61, 0.0  ;;  %v513_v3 = vmax.f32 %v1532_v62, 0.0  ;;  %1100 = vmatprep.subr.mxu1 %v587_v54  ;;  %v874_v54 = vld [vmem:[%s1728_s9 + $0x50] sm:$0xff] }
 0x1e6   :  { %1101 = vmatpush3.msra.mxu1 %v571_v55  ;;  %v873_v55 = vld [vmem:[%s1728_s9 + $0x48] sm:$0xff] }
 0x1e7   :  { %v1292_v4 = vpack.i.bf16 %v512_v1, %v511_v2  ;;  %v1297_v6 = vpack.i.bf16 %v510_v5, %v513_v3  ;;  %1102 = vmatprep.subr.mxu1 %v586_v56  ;;  %v872_v56 = vld [vmem:[%s1728_s9 + $0x40] sm:$0xff] }
 0x1e8   :  { %1103 = vmatpush3.msra.mxu1 %v570_v57  ;;  %v871_v57 = vld [vmem:[%s1728_s9 + $0x38] sm:$0xff] }
 0x1e9   :  { %1293 = vrot.lane.b32.xlu0 %v1292_v4, %s1431_s3  ;;  %v584_v4 = vld [vmem:[#allocation7 + $0xa0] sm:$0xff]  ;;  %1104 = vmatprep.subr.mxu1 %v585_v59  ;;  %v870_v59 = vld [vmem:[%s1728_s9 + $0x30] sm:$0xff] }
 0x1ea   :  { %1105 = vmatpush3.msra.mxu1 %v569_v60  ;;  %v869_v60 = vld [vmem:[%s1728_s9 + $0x28] sm:$0xff] }
 0x1eb   :  { %1106 = vmatprep.subr.mxu1 %v584_v4  ;;  %v868_v4 = vld [vmem:[%s1728_s9 + $0x20] sm:$0xff] }
 0x1ed   :  { %1298 = vrot.lane.b32.xlu0 %v1297_v6, %s1431_s3  ;;  %v568_v6 = vld [vmem:[#allocation7 + $0x20] sm:$0xff] }
 0x1ee   :  { %1107 = vmatpush3.msra.mxu1 %v568_v6  ;;  %v867_v6 = vld [vmem:[%s1728_s9 + $0x18] sm:$0xff] }
 0x1ef   :  { %1108 = vmatprep.subr.mxu1 %v583_v8  ;;  %v865_v8 = vld [vmem:[%s1728_s9 + $0x8] sm:$0xff] }
 0x1f0   :  { %1109 = vmatpush3.msra.mxu1 %v567_v10  ;;  %v1574_v61 = vpop.f32.mrf.mxu1  ;;  %v973_v10 = vld [vmem:[%s1730_s11 + $0x78] sm:$0xff] }
 0x1f1   :  { %1110 = vmatprep.subr.mxu1 %v582_v13  ;;  %v970_v13 = vld [vmem:[%s1730_s11 + $0x60] sm:$0xff] }
 0x1f2   :  { %1111 = vmatpush3.msra.mxu1 %v566_v17  ;;  %v1206_v58 = vpop.f32.mrf.mxu1  ;;  %v966_v17 = vld [vmem:[%s1730_s11 + $0x40] sm:$0xff] }
 0x1f3   :  { %1112 = vmatprep.subr.mxu1 %v581_v19  ;;  %v964_v19 = vld [vmem:[%s1730_s11 + $0x30] sm:$0xff]  ;;  %v1074_v58 = vld [vmem:[%s1731_s12] ss:$0 sm:$0xff] }
 0x1f4   :  { %1113 = vmatpush3.msra.mxu1 %v565_v22  ;;  %v961_v22 = vld [vmem:[%s1730_s11 + $0x18] sm:$0xff] }
 0x1f5   :  { %1114 = vmatprep.subr.mxu1 %v580_v27 }
 0x1f6   :  { %1115 = vmatpush3.msra.mxu1 %v564_v29 }
 0x1f7   :  { %1207 = vmatprep.subr.mxu1 %v1430_v0 }
 0x25b   :  { %v1294_v11 = vpop.permute.xlu0 %1293 }
 0x25c   :  { %v1296_v15 = vunpack.i.h.bf16 %v1294_v11  ;;  %v1295_v16 = vunpack.i.l.bf16 %v1294_v11  ;;  %v972_v11 = vld [vmem:[%s1730_s11 + $0x70] sm:$0xff] }
 0x25e   :  { %v528_v26 = vsel %vm526_vm3, %v1295_v16, %v1296_v15 }
 0x25f   :  { %v1299_v21 = vpop.permute.xlu0 %1298  ;;  %v536_v35 = vmax.f32 %v511_v2, %v528_v26 }
 0x260   :  { %v1301_v24 = vunpack.i.h.bf16 %v1299_v21  ;;  %v1300_v25 = vunpack.i.l.bf16 %v1299_v21  ;;  %v962_v21 = vld [vmem:[%s1730_s11 + $0x20] sm:$0xff] }
 0x262   :  { %v527_v31 = vsel %vm526_vm3, %v1301_v24, %v1295_v16  ;;  %v534_v32 = vsel %vm526_vm3, %v1300_v25, 0.0  ;;  %v529_v33 = vsel %vm526_vm3, %v1296_v15, %v1300_v25  ;;  %v968_v15 = vld [vmem:[%s1730_s11 + $0x50] sm:$0xff]  ;;  %v967_v16 = vld [vmem:[%s1730_s11 + $0x48] sm:$0xff] }
 0x263   :  { %v537_v36 = vmax.f32 %v512_v1, %v529_v33  ;;  %v538_v37 = vmax.f32 %v513_v3, %v534_v32  ;;  %v535_v39 = vmax.f32 %v510_v5, %v527_v31 }
 0x265   :  { %v1302_v38 = vpack.i.bf16 %v537_v36, %v536_v35  ;;  %v1307_v40 = vpack.i.bf16 %v538_v37, %v535_v39 }
 0x267   :  { %1303 = vrot.lane.b32.xlu1 %v1302_v38, %s1433_s1 }
 0x26b   :  { %1308 = vrot.lane.b32.xlu1 %v1307_v40, %s1433_s1 }
 0x2d9   :  { %v1304_v1 = vpop.permute.xlu1 %1303 }
 0x2da   :  { %v1306_v2 = vunpack.i.h.bf16 %v1304_v1  ;;  %v1305_v41 = vunpack.i.l.bf16 %v1304_v1 }
 0x2dc   :  { %v553_v42 = vsel %vm551_vm4, %v1305_v41, %v1306_v2 }
 0x2dd   :  { %v1309_v43 = vpop.permute.xlu1 %1308  ;;  %v561_v44 = vmax.f32 %v536_v35, %v553_v42  ;;  %v959_v35 = vld [vmem:[%s1730_s11 + $0x8] sm:$0xff] }
 0x2de   :  { %v1311_v62 = vunpack.i.h.bf16 %v1309_v43  ;;  %v1310_v3 = vunpack.i.l.bf16 %v1309_v43 }
 0x2df   :  { %779 = vmatprep.mubr.f32.mxu1 %v561_v44 }
 0x2e0   :  { %v559_v45 = vsel %vm551_vm4, %v1311_v62, 0.0  ;;  %v552_v63 = vsel %vm551_vm4, %v1310_v3, %v1305_v41  ;;  %v554_v5 = vsel %vm551_vm4, %v1306_v2, %v1311_v62 }
 0x2e1   :  { %v563_v46 = vmax.f32 %v538_v37, %v559_v45  ;;  %v560_v47 = vmax.f32 %v535_v39, %v552_v63  ;;  %v562_v48 = vmax.f32 %v537_v36, %v554_v5  ;;  %v958_v36 = vld [vmem:[%s1730_s11] sm:$0xff]  ;;  %s1392_s11 = scalar_lea.vmem %s1060_s15, 32 }
 0x2e2   :  { %v1073_v37 = vld [vmem:[%s1729_s10] ss:$0 sm:$0xff]  ;;  %p1393_p6 = scmp.ne.s32.totalorder %s1060_s15, %s1392_s11  ;;  %p1398_p8 = scmp.lt.s32.totalorder %s1392_s11, %s1392_s11 }
 0x2e3   :  { %780 = vmatmul.mubr.f32.vlgmr.msra.gmra.mxu1 %v560_v47  ;;  %849 = vmatprep.mubr.f32.mxu0 %v563_v46 }
 0x2e4   :  { %850 = vmatmul.mubr.f32.vlgmr.msra.gmra.mxu0 %v562_v48  ;;  %1208 = vmatpush3.msra.mxu1 %v879_v49  ;;  %p1399_p9 = por %p1398_p8, %p1397_p7 }
 0x2e5   :  { %1209 = vmatprep.subr.mxu1 %v1430_v0  ;;  %1239 = vmatprep.mubr.msk.f32.mxu1 %vm1432_vm1, %v1430_v0 }
 0x2e6   :  { %1210 = vmatpush3.msra.mxu1 %v878_v50  ;;  %1274 = vmatprep.mubr.msk.f32.mxu0 %vm1432_vm1, %v1430_v0  ;;  %p1400_p10 = pnand %p1399_p9, %p1393_p6 }
 0x2e7   :  { %1211 = vmatprep.subr.mxu1 %v1430_v0  ;;  %1243 = vmatpush3.msra.mxu0 %v973_v10 }
 0x2e8   :  { %1212 = vmatpush3.msra.mxu1 %v877_v51  ;;  %1244 = vmatprep.subr.mxu0 %v1430_v0 }
 0x2e9   :  { %1213 = vmatprep.subr.mxu1 %v1430_v0  ;;  %1245 = vmatpush3.msra.mxu0 %v972_v11 }
 0x2ea   :  { %1214 = vmatpush3.msra.mxu1 %v876_v52  ;;  %1246 = vmatprep.subr.mxu0 %v1430_v0 }
 0x2eb   :  { %1215 = vmatprep.subr.mxu1 %v1430_v0  ;;  %1247 = vmatpush3.msra.mxu0 %v971_v12 }
 0x2ec   :  { %1216 = vmatpush3.msra.mxu1 %v875_v53  ;;  %1248 = vmatprep.subr.mxu0 %v1430_v0 }
 0x2ed   :  { %1217 = vmatprep.subr.mxu1 %v1430_v0  ;;  %1249 = vmatpush3.msra.mxu0 %v970_v13 }
 0x2ee   :  { %1218 = vmatpush3.msra.mxu1 %v874_v54  ;;  %1250 = vmatprep.subr.mxu0 %v1430_v0 }
 0x2ef   :  { %1219 = vmatprep.subr.mxu1 %v1430_v0  ;;  %1251 = vmatpush3.msra.mxu0 %v969_v14 }
 0x2f0   :  { %1220 = vmatpush3.msra.mxu1 %v873_v55  ;;  %1252 = vmatprep.subr.mxu0 %v1430_v0 }
 0x2f1   :  { %1221 = vmatprep.subr.mxu1 %v1430_v0  ;;  %1253 = vmatpush3.msra.mxu0 %v968_v15 }
 0x2f2   :  { %1222 = vmatpush3.msra.mxu1 %v872_v56  ;;  %1254 = vmatprep.subr.mxu0 %v1430_v0 }
 0x2f3   :  { %1223 = vmatprep.subr.mxu1 %v1430_v0  ;;  %1255 = vmatpush3.msra.mxu0 %v967_v16 }
 0x2f4   :  { %1224 = vmatpush3.msra.mxu1 %v871_v57  ;;  %1256 = vmatprep.subr.mxu0 %v1430_v0 }
 0x2f5   :  { %1225 = vmatprep.subr.mxu1 %v1430_v0  ;;  %1257 = vmatpush3.msra.mxu0 %v966_v17 }
 0x2f6   :  { %1226 = vmatpush3.msra.mxu1 %v870_v59  ;;  %1258 = vmatprep.subr.mxu0 %v1430_v0 }
 0x2f7   :  { %1227 = vmatprep.subr.mxu1 %v1430_v0  ;;  %1259 = vmatpush3.msra.mxu0 %v965_v18 }
 0x2f8   :  { %1228 = vmatpush3.msra.mxu1 %v869_v60  ;;  %1260 = vmatprep.subr.mxu0 %v1430_v0 }
 0x2f9   :  { %1229 = vmatprep.subr.mxu1 %v1430_v0  ;;  %1261 = vmatpush3.msra.mxu0 %v964_v19 }
 0x2fa   :  { %1230 = vmatpush3.msra.mxu1 %v868_v4  ;;  %1262 = vmatprep.subr.mxu0 %v1430_v0 }
 0x2fb   :  { %1231 = vmatprep.subr.mxu1 %v1430_v0  ;;  %1263 = vmatpush3.msra.mxu0 %v963_v20 }
 0x2fc   :  { %1232 = vmatpush3.msra.mxu1 %v867_v6  ;;  %1264 = vmatprep.subr.mxu0 %v1430_v0 }
 0x2fd   :  { %1233 = vmatprep.subr.mxu1 %v1430_v0  ;;  %1265 = vmatpush3.msra.mxu0 %v962_v21 }
 0x2fe   :  { %1234 = vmatpush3.msra.mxu1 %v866_v7  ;;  %1266 = vmatprep.subr.mxu0 %v1430_v0 }
 0x2ff   :  { %1235 = vmatprep.subr.mxu1 %v1430_v0  ;;  %1267 = vmatpush3.msra.mxu0 %v961_v22 }
 0x300   :  { %1236 = vmatpush3.msra.mxu1 %v865_v8  ;;  %1268 = vmatprep.subr.mxu0 %v1430_v0 }
 0x301   :  { %1237 = vmatprep.subr.mxu1 %v1430_v0  ;;  %1269 = vmatpush3.msra.mxu0 %v960_v34 }
 0x302   :  { %1238 = vmatpush3.msra.mxu1 %v864_v9  ;;  %1270 = vmatprep.subr.mxu0 %v1430_v0 }
 0x303   :  { %1271 = vmatpush3.msra.mxu0 %v959_v35 }
 0x304   :  { %1272 = vmatprep.subr.mxu0 %v1430_v0 }
 0x305   :  { %1273 = vmatpush3.msra.mxu0 %v958_v36 }
 0x3a3   :  { %v1116_v23 = vpop.f32.mrf.mxu1 }
 0x3a4   :  { %v1151_v24 = vpop.f32.mrf.mxu0 }
 0x3a5   :  { %v1117_v25 = vpop.f32.mrf.mxu1 }
 0x3a6   :  { %v1118_v26 = vadd.f32 %v1117_v25, %v1116_v23  ;;  %v1152_v27 = vpop.f32.mrf.mxu0 }
 0x3a7   :  { %v1153_v28 = vadd.f32 %v1152_v27, %v1151_v24 }
 0x3a8   :  { %v782_v29 = vadd.f32 %v1118_v26, %v1574_v61 }
 0x3aa   :  { %v852_v31 = vadd.f32 %v1153_v28, %v782_v29 }
 0x3ac   :  { %v862_v32 = vadd.f32 %v1072_v30, %v852_v31 }
 0x3ae   :  { %v863_v33 = vmax.f32 %v862_v32, 0.0 }
 0x3b0   :  { %1240 = vmatmul.mubr.f32.vlgmr.msra.gmra.mxu1 %v863_v33 }
 0x470   :  { %v953_v38 = vpop.f32.mrf.mxu1 }
 0x471   :  { %v954_v39 = vadd.f32 %v1073_v37, %v953_v38 }
 0x472   :  { %v1241_v40 = vpop.f32.mrf.mxu1 }
 0x473   :  { %v957_v61 = vmax.f32 %v954_v39, 0.0 }
 0x475   :  { %1275 = vmatmul.mubr.f32.vlgmr.msra.gmra.mxu0 %v957_v61 }
 0x535   :  { %v1047_v0 = vpop.f32.mrf.mxu0 }
 0x536   :  { %v1048_v1 = vadd.f32 %v1074_v58, %v1047_v0 }
 0x537   :  { %v1276_v2 = vpop.f32.mrf.mxu0 }
 0x538   :  { %1052 = vst.msk [vmem:[#allocation10] sm:$0x3] %vm1051_vm5, %v1048_v1 }
 0x539   :  { %1403 = shalt.err (!%p1400_p10)
}
 0x53a   :  { %1062 = dma.vmem_to_hbm [thread:$0]  %s1060_s15, 32, %s1732_s13, [#allocation4]  }
 0x53b   :  { %1418 = dma.done.wait [#allocation4], 32  }
 0x53c   :  { %1419 = vsyncadd [#allocation4], 4294967264 }
 0x53d   :  { %1066 = vsyncpa [#allocation3], 1 }
 0x53e   :  { %1067 = vsyncpa [#allocation6], 1 }
 0x53f   :  { %1068 = vsyncpa [#allocation9], 1 }
 0x540   :  { %1069 = vsyncpa [#allocation4], 1 }

</bundles_post_ra>
